<compile_context>
chip_gen: v7x
topology: tpu7x:2x2x1
jax: 0.10.0
libtpu: 0.0.40
codegen_flags: <defaults>
</compile_context>

<pallas_src>
import jax
import jax.numpy as jnp
from jax import lax
from jax.experimental import pallas as pl
from jax.experimental.pallas import tpu as pltpu

# Contract dim 1 of the activation with dim 1 of the (out, in) weight,
# i.e. x @ W^T, without materializing a transposed weight.
_CONTRACT_LAST = (((1,), (1,)), ((), ()))


def mlp_kernel(x_ref, w1_ref, b1_ref, w2_ref, b2_ref, w3_ref, b3_ref, o_ref):
    x = x_ref[...]
    # Layer 1: Linear + ReLU   (B, in) x (hidden, in)^T -> (B, hidden)
    h1 = lax.dot_general(x, w1_ref[...], _CONTRACT_LAST,
                         preferred_element_type=jnp.float32)
    h1 = jnp.maximum(h1 + b1_ref[...], 0.0)
    # Layer 2: Linear + ReLU   (B, hidden) x (hidden, hidden)^T -> (B, hidden)
    h2 = lax.dot_general(h1, w2_ref[...], _CONTRACT_LAST,
                         preferred_element_type=jnp.float32)
    h2 = jnp.maximum(h2 + b2_ref[...], 0.0)
    # Layer 3: Linear (no activation)   (B, hidden) x (out, hidden)^T -> (B, out)
    out = lax.dot_general(h2, w3_ref[...], _CONTRACT_LAST,
                          preferred_element_type=jnp.float32)
    o_ref[...] = (out + b3_ref[...]).astype(o_ref.dtype)


def _net_forward(x, w1, b1, w2, b2, w3, b3, *, batch_tile=512):
    """x: (B, in). w*: PyTorch-convention (out, in). b*: (1, out)."""
    B, in_dim = x.shape
    hidden = w1.shape[0]
    out_dim = w3.shape[0]

    # Advisory cost hint for XLA's scheduler.
    flops = 2 * B * (in_dim * hidden + hidden * hidden + hidden * out_dim)
    nbytes = sum(int(a.size) * a.dtype.itemsize
                 for a in (x, w1, b1, w2, b2, w3, b3))
    nbytes += B * out_dim * x.dtype.itemsize
    cost = pl.CostEstimate(flops=flops, transcendentals=0,
                           bytes_accessed=nbytes)

    if B <= batch_tile:
        # Small batch: single block, no grid (a grid would only add per-step
        # overhead; the whole problem fits trivially in VMEM).
        full = lambda shape: pl.BlockSpec(shape, lambda: (0,) * len(shape))
        grid = ()
        in_specs = [
            full((B, in_dim)),
            full((hidden, in_dim)), full((1, hidden)),
            full((hidden, hidden)), full((1, hidden)),
            full((out_dim, hidden)), full((1, out_dim)),
        ]
        out_specs = full((B, out_dim))
        compiler_params = None
    else:
        # Large batch: tile the batch axis; weights/biases return block (0, 0)
        # for every i so they stay resident in VMEM across all grid steps,
        # while x/out tile DMAs pipeline against compute.  "parallel" lets the
        # batch axis shard across TensorCores on v7x (no-op on v5e/v6e); it is
        # safe because each grid step writes a disjoint output tile.
        tb = batch_tile
        resident = lambda shape: pl.BlockSpec(shape, lambda i: (0,) * len(shape))
        grid = (pl.cdiv(B, tb),)
        in_specs = [
            pl.BlockSpec((tb, in_dim), lambda i: (i, 0)),
            resident((hidden, in_dim)), resident((1, hidden)),
            resident((hidden, hidden)), resident((1, hidden)),
            resident((out_dim, hidden)), resident((1, out_dim)),
        ]
        out_specs = pl.BlockSpec((tb, out_dim), lambda i: (i, 0))
        compiler_params = pltpu.CompilerParams(
            dimension_semantics=("parallel",))

    return pl.pallas_call(
        mlp_kernel,
        out_shape=jax.ShapeDtypeStruct((B, out_dim), x.dtype),
        grid=grid,
        in_specs=in_specs,
        out_specs=out_specs,
        cost_estimate=cost,
        compiler_params=compiler_params,
    )(x, w1, b1, w2, b2, w3, b3)


# One fused custom call per forward; batch_tile is a static tiling knob.
net_forward = jax.jit(_net_forward, static_argnames=("batch_tile",))

# TODO(synk): for DDQN's double forward (online + target nets), stack the two
# weight sets and run both through a single pallas_call to halve dispatch/DMA
# overhead; kept single-net here to match the module spec.


def init_linear(key, out_dim, in_dim):
    """nn.Linear-style uniform(-1/sqrt(in), 1/sqrt(in)); bias stored (1, out)."""
    kw, kb = jax.random.split(key)
    bound = 1.0 / jnp.sqrt(jnp.float32(in_dim))
    w = jax.random.uniform(kw, (out_dim, in_dim), jnp.float32, -bound, bound)
    b = jax.random.uniform(kb, (1, out_dim), jnp.float32, -bound, bound)
    return w, b


def _reference(x, w1, b1, w2, b2, w3, b3):
    h1 = jnp.maximum(x @ w1.T + b1, 0.0)
    h2 = jnp.maximum(h1 @ w2.T + b2, 0.0)
    return h2 @ w3.T + b3


if __name__ == "__main__":
    # Pendulum DDQN sizes: state dim = 3, discretized actions = 5, hidden = 32.
    batch, in_dim, hidden, out_dim = 8, 3, 32, 5

    key = jax.random.PRNGKey(0)
    kx, k1, k2, k3, kbig = jax.random.split(key, 5)

    x = jax.random.normal(kx, (batch, in_dim), jnp.float32)
    w1, b1 = init_linear(k1, hidden, in_dim)
    w2, b2 = init_linear(k2, hidden, hidden)
    w3, b3 = init_linear(k3, out_dim, hidden)

    # Small-batch (inference / action-selection) path: grid=().
    out = net_forward(x, w1, b1, w2, b2, w3, b3)
    out = jax.block_until_ready(out)
    ref = _reference(x, w1, b1, w2, b2, w3, b3)
    assert out.shape == (batch, out_dim)
    assert jnp.allclose(out, ref, atol=1e-5, rtol=1e-5)

    # Replay-buffer-sized batch: exercises the batch-grid path
    # (weights resident, batch axis "parallel" -> 2nd TensorCore on v7x).
    big_b = 1024
    x_big = jax.random.normal(kbig, (big_b, in_dim), jnp.float32)
    out_big = net_forward(x_big, w1, b1, w2, b2, w3, b3)
    out_big = jax.block_until_ready(out_big)
    ref_big = _reference(x_big, w1, b1, w2, b2, w3, b3)
    assert out_big.shape == (big_b, out_dim)
    assert jnp.allclose(out_big, ref_big, atol=1e-4, rtol=1e-4)

    print("KERNEL_OK")
</pallas_src>

<mosaic_0001>
module attributes {stable_mosaic.version = 11 : i64} {
  func.func @mlp_kernel(%arg0: memref<8x3xf32, #tpu.memory_space<vmem>>, %arg1: memref<32x3xf32, #tpu.memory_space<vmem>>, %arg2: memref<1x32xf32, #tpu.memory_space<vmem>>, %arg3: memref<32x32xf32, #tpu.memory_space<vmem>>, %arg4: memref<1x32xf32, #tpu.memory_space<vmem>>, %arg5: memref<5x32xf32, #tpu.memory_space<vmem>>, %arg6: memref<1x5xf32, #tpu.memory_space<vmem>>, %arg7: memref<8x5xf32, #tpu.memory_space<vmem>>) attributes {dimension_semantics = [], scalar_prefetch = 0 : i64, scratch_operands = 0 : i64, tpu.core_type = #tpu.core_type<tc>} {
    %c0 = arith.constant 0 : index
    %c0_0 = arith.constant 0 : index
    %0 = vector.load %arg0[%c0, %c0_0] : memref<8x3xf32, #tpu.memory_space<vmem>>, vector<8x3xf32>
    %c0_1 = arith.constant 0 : index
    %c0_2 = arith.constant 0 : index
    %1 = vector.load %arg1[%c0_1, %c0_2] : memref<32x3xf32, #tpu.memory_space<vmem>>, vector<32x3xf32>
    %cst = arith.constant dense<0.000000e+00> : vector<8x32xf32>
    %2 = tpu.matmul %0, %1, %cst {dimension_numbers = #tpu.dot_dimension_numbers<[1], [1], [0], [0], [0, 0, 1, 0], [], []>} : vector<8x3xf32>, vector<32x3xf32>, vector<8x32xf32> -> vector<8x32xf32>
    %c0_3 = arith.constant 0 : index
    %c0_4 = arith.constant 0 : index
    %3 = vector.load %arg2[%c0_3, %c0_4] : memref<1x32xf32, #tpu.memory_space<vmem>>, vector<1x32xf32>
    %4 = vector.broadcast %3 : vector<1x32xf32> to vector<8x32xf32>
    %5 = arith.addf %2, %4 : vector<8x32xf32>
    %cst_5 = arith.constant 0.000000e+00 : f32
    %6 = vector.broadcast %cst_5 : f32 to vector<8x32xf32>
    %7 = arith.maximumf %5, %6 : vector<8x32xf32>
    %c0_6 = arith.constant 0 : index
    %c0_7 = arith.constant 0 : index
    %8 = vector.load %arg3[%c0_6, %c0_7] : memref<32x32xf32, #tpu.memory_space<vmem>>, vector<32x32xf32>
    %cst_8 = arith.constant dense<0.000000e+00> : vector<8x32xf32>
    %9 = tpu.matmul %7, %8, %cst_8 {dimension_numbers = #tpu.dot_dimension_numbers<[1], [1], [0], [0], [0, 0, 1, 0], [], []>} : vector<8x32xf32>, vector<32x32xf32>, vector<8x32xf32> -> vector<8x32xf32>
    %c0_9 = arith.constant 0 : index
    %c0_10 = arith.constant 0 : index
    %10 = vector.load %arg4[%c0_9, %c0_10] : memref<1x32xf32, #tpu.memory_space<vmem>>, vector<1x32xf32>
    %11 = vector.broadcast %10 : vector<1x32xf32> to vector<8x32xf32>
    %12 = arith.addf %9, %11 : vector<8x32xf32>
    %cst_11 = arith.constant 0.000000e+00 : f32
    %13 = vector.broadcast %cst_11 : f32 to vector<8x32xf32>
    %14 = arith.maximumf %12, %13 : vector<8x32xf32>
    %c0_12 = arith.constant 0 : index
    %c0_13 = arith.constant 0 : index
    %15 = vector.load %arg5[%c0_12, %c0_13] : memref<5x32xf32, #tpu.memory_space<vmem>>, vector<5x32xf32>
    %cst_14 = arith.constant dense<0.000000e+00> : vector<8x5xf32>
    %16 = tpu.matmul %14, %15, %cst_14 {dimension_numbers = #tpu.dot_dimension_numbers<[1], [1], [0], [0], [0, 0, 1, 0], [], []>} : vector<8x32xf32>, vector<5x32xf32>, vector<8x5xf32> -> vector<8x5xf32>
    %c0_15 = arith.constant 0 : index
    %c0_16 = arith.constant 0 : index
    %17 = vector.load %arg6[%c0_15, %c0_16] : memref<1x5xf32, #tpu.memory_space<vmem>>, vector<1x5xf32>
    %18 = vector.broadcast %17 : vector<1x5xf32> to vector<8x5xf32>
    %19 = arith.addf %16, %18 : vector<8x5xf32>
    %c0_17 = arith.constant 0 : index
    %c0_18 = arith.constant 0 : index
    %20 = vector.load %arg7[%c0_17, %c0_18] : memref<8x5xf32, #tpu.memory_space<vmem>>, vector<8x5xf32>
    tpu.vector_store %arg7[%c0_17, %c0_18], %19 {strides = array<i32>} : memref<8x5xf32, #tpu.memory_space<vmem>>, vector<8x5xf32>,
    return
  }
}

</mosaic_0001>

<bundles_post_ra>
// kernel: _net_forward.1
= control target key start
LH: loop header
LB: loop body
LE: loop exit
PB: predicated region body
PF: predicated region fallthrough
CT: control target
= control target key end

     0   :  { %vm39_vm0 = vcmask 23552   ;;  %v422_v2 = vmov 0.0|0.0   ;;  %vm137_vm2 = vcmask 261120   ;;  %vm423_vm3 = vmmov 0   ;;  %s544_s0 = inlined_call_operand.vmem [shape: f32[8,3], index: 0, kind: input, shape index: {}]   ;;  %s545_s1 = inlined_call_operand.vmem [shape: f32[32,3], index: 1, kind: input, shape index: {}]   ;;  %s546_s2 = inlined_call_operand.vmem [shape: f32[1,32], index: 2, kind: input, shape index: {}]   ;;  %s547_s3 = inlined_call_operand.vmem [shape: f32[32,32], index: 3, kind: input, shape index: {}]   ;;  %s548_s4 = inlined_call_operand.vmem [shape: f32[1,32], index: 4, kind: input, shape index: {}]   ;;  %s549_s5 = inlined_call_operand.vmem [shape: f32[5,32], index: 5, kind: input, shape index: {}]   ;;  %s550_s6 = inlined_call_operand.vmem [shape: f32[1,5], index: 6, kind: input, shape index: {}]   ;;  %s551_s7 = inlined_call_operand.hbm [shape: f32[8,5], index: 7, kind: output, shape index: {}]  }
   0x1   :  { %v28_v0 = vld [vmem:[%s545_s1] sm:$0xff]  ;;  %v29_v1 = vld [vmem:[%s545_s1 + $0x8] sm:$0xff]  ;;  %378 = vmatprep.subr.bf16.mxu0 %v422_v2  ;;  %vm474_vm1 = vmpackc.low %vm39_vm0, %vm39_vm0  ;;  %386 = vmatprep.subr.bf16.mxu1 %v422_v2  ;;  %v424_v5 = vmov 0.0  }
   0x2   :  { %v379_v3 = vpack.c.bf16 %v29_v1, %v28_v0  ;;  %359 = vmatprep.mubr.msk.f32.mxu0 %vm423_vm3, %v424_v5  ;;  %v126_v6 = vld [vmem:[%s547_s3] sm:$0xff]  ;;  %v127_v7 = vld [vmem:[%s547_s3 + $0x8] sm:$0xff]  ;;  %vm487_vm4 = vmpackc.low %vm137_vm2, %vm137_vm2  ;;  %370 = vmatprep.mubr.msk.f32.mxu1 %vm423_vm3, %v424_v5 }
   0x3   :  { %v387_v9 = vpack.c.bf16 %v127_v7, %v126_v6  ;;  %v30_v10 = vld [vmem:[%s545_s1 + $0x10] sm:$0xff]  ;;  %v31_v11 = vld [vmem:[%s545_s1 + $0x18] sm:$0xff] }
   0x4   :  { %381 = vmatpush3.bf16.xpose.msk.msra.mxu0 %vm474_vm1, %v379_v3 }
   0x5   :  { %382 = vmatprep.subr.bf16.mxu0 %v422_v2 }
   0x6   :  { %12 = vsyncpa [#allocation3], 0  ;;  %389 = vmatpush3.bf16.xpose.msk.msra.mxu1 %vm487_vm4, %v387_v9  ;;  %v128_v12 = vld [vmem:[%s547_s3 + $0x10] sm:$0xff]  ;;  %v129_v13 = vld [vmem:[%s547_s3 + $0x18] sm:$0xff]  ;;  %v383_v14 = vpack.c.bf16 %v31_v11, %v30_v10  ;;  %s425_s23 = smov [#allocation2]   ;;  %vm308_vm5 = vcmask 39936  }
   0x7   :  { %390 = vmatprep.subr.bf16.mxu1 %v422_v2  ;;  %v391_v15 = vpack.c.bf16 %v129_v13, %v128_v12  ;;  %v27_v16 = vld [vmem:[%s544_s0] sm:$0xff]  ;;  %s316_s24 = sshll.u32 %s425_s23, 4  ;;  %s317_s24 = int_to_ptr.vmem [resolvable:$true] %s316_s24 }
   0x8   :  { %v324_v17 = vld [vmem:[%s546_s2] ss:$0 sm:$0xff]  ;;  %p403_p1 = scmp.lt.s32.totalorder %s317_s24, %s317_s24 }
   0x9   :  { %v224_v22 = vld [vmem:[%s549_s5] sm:$0x1f]  ;;  %s398_s5 = scalar_lea.vmem %s317_s24, 128 }
   0xa   :  { %v330_v23 = vld [vmem:[%s548_s4] ss:$0 sm:$0xff]  ;;  %p399_p0 = scmp.ne.s32.totalorder %s317_s24, %s398_s5  ;;  %p404_p2 = scmp.lt.s32.totalorder %s398_s5, %s398_s5 }
   0xb   :  { %v336_v28 = vld [vmem:[%s550_s6] ss:$0 sm:$0xff] }
   0xc   :  { %385 = vmatpush3.bf16.xpose.msk.msra.mxu0 %vm474_vm1, %v383_v14  ;;  %p405_p3 = por %p404_p2, %p403_p1 }
   0xd   :  { %373 = vmatprep.subr.mxu0 %v424_v5 }
   0xe   :  { %393 = vmatpush3.bf16.xpose.msk.msra.mxu1 %vm487_vm4, %v391_v15  ;;  %p406_p4 = pnand %p405_p3, %p399_p0 }
  0x13   :  { %360 = vmatmul.mubr.msk.f32.vlgmr.msra.gmra.mrb[0].mxu0 %vm39_vm0, %v27_v16 }
  0x14   :  { %375 = vmatprep.mubr.msk.f32.mxu0 %vm423_vm3, %v424_v5  ;;  %374 = vmatpush3.xpose.msk.msra.mxu0 %vm137_vm2, %v224_v22 }
  0xe6   :  { %v121_v18 = vpop.f32.mrb[0].mxu0 }
  0xe7   :  { %v122_v19 = vadd.f32 %v324_v17, %v121_v18  ;;  %v361_v20 = vpop.f32.mrb[1].mxu0 }
  0xe9   :  { %v125_v21 = vmax.f32 %v122_v19, 0.0 }
  0xeb   :  { %371 = vmatmul.mubr.msk.f32.vlgmr.msra.gmra.mrb[0].mxu1 %vm137_vm2, %v125_v21 }
 0x1be   :  { %v219_v24 = vpop.f32.mrb[0].mxu1 }
 0x1bf   :  { %v220_v25 = vadd.f32 %v330_v23, %v219_v24  ;;  %v372_v26 = vpop.f32.mrb[1].mxu1 }
 0x1c1   :  { %v223_v27 = vmax.f32 %v220_v25, 0.0 }
 0x1c3   :  { %376 = vmatmul.mubr.msk.f32.vlgmr.msra.gmra.mrb[2].mxu0 %vm137_vm2, %v223_v27 }
 0x296   :  { %v304_v29 = vpop.f32.mrb[2].mxu0 }
 0x297   :  { %v305_v30 = vadd.f32 %v336_v28, %v304_v29  ;;  %v377_v31 = vpop.f32.mrb[3].mxu0 }
 0x299   :  { %309 = vst.msk [vmem:[#allocation2] sm:$0xff] %vm308_vm5, %v305_v30 }
 0x29a   :  { %409 = shalt.err (!%p406_p4)
}
 0x29b   :  { %s410_s26 = scalar_lea.hbm %s551_s7, 128 }
 0x29c   :  { %p411_p5 = scmp.ne.s32.totalorder %s551_s7, %s410_s26  ;;  %p414_p6 = scmp.lt.u32.totalorder %s410_s26, %s551_s7 }
 0x29e   :  { %p416_p7 = pnand %p414_p6, %p411_p5 }
 0x2a0   :  { %419 = shalt.err (!%p416_p7)
}
 0x2a1   :  { %319 = dma.vmem_to_hbm [thread:$0]  %s317_s24, 128, %s551_s7, [#allocation3]  }
 0x2a2   :  { %420 = dma.done.wait [#allocation3], 128  }
 0x2a3   :  { %421 = vsyncadd [#allocation3], 4294967168 }
 0x2a4   :  { %323 = vsyncpa [#allocation3], 1 }

</bundles_post_ra>
